<compile_context>
chip_gen: v7x
topology: tpu7x:2x2x1
jax: 0.10.0
libtpu: 0.0.40
codegen_flags: <defaults>
</compile_context>

<pallas_src>
import math

import jax
import jax.numpy as jnp
import numpy as np
from jax import lax
from jax.experimental import pallas as pl
from jax.experimental.pallas import tpu as pltpu

D_MODEL = 32
D_FF = 64
S_TGT = 8
S_SRC = 8
BATCH = 2
EPS = 1e-6


# ---------------------------------------------------------------------------
# In-kernel helpers (traced inside the Pallas kernel body)
# ---------------------------------------------------------------------------
def _layer_norm(x):
    # alpha = 1, bias = 1, unbiased std (torch default), divide by (std + eps)
    mean = jnp.mean(x, axis=-1, keepdims=True)
    xm = x - mean
    var = jnp.sum(xm * xm, axis=-1, keepdims=True) / (x.shape[-1] - 1)
    std = jnp.sqrt(var)
    return xm * pl.reciprocal(std + EPS, approx=True) + 1.0


def _attn_core(q, k, v, wo, bo):
    # q is already scaled by 1/sqrt(d_k) (folded into W_q / b_q at pack time).
    # Contract q dim 1 with k dim 1 directly (no explicit transpose of k).
    s = lax.dot_general(q, k, (((1,), (1,)), ((), ())),
                        preferred_element_type=jnp.float32)
    # masked_fill in the reference is non-in-place and discarded -> mask ignored.
    m = jnp.max(s, axis=-1, keepdims=True)
    e = jnp.exp(s - m)
    p = e * pl.reciprocal(jnp.sum(e, axis=-1, keepdims=True), approx=True)
    o = jnp.dot(p, v, preferred_element_type=jnp.float32)
    return jnp.dot(o, wo, preferred_element_type=jnp.float32) + bo


# ---------------------------------------------------------------------------
# Pallas kernel: one full decoder block per batch element
# ---------------------------------------------------------------------------
def decoder_block_kernel(
    x_ref, enc_ref,
    sa_wqkv, sa_bqkv, sa_wo, sa_bo,
    ca_wqkv, ca_bqkv, ca_wo, ca_bo,
    ff_w1, ff_b1, ff_w2, ff_b2,
    o_ref,
):
    x = x_ref[0]      # (S_TGT, D_MODEL)
    enc = enc_ref[0]  # (S_SRC, D_MODEL)

    # residual 0: self-attention on pre-normed x (fused QKV projection)
    xn = _layer_norm(x)
    qkv = jnp.dot(xn, sa_wqkv[...], preferred_element_type=jnp.float32) + sa_bqkv[...]
    q = qkv[:, :D_MODEL]
    k = qkv[:, D_MODEL:2 * D_MODEL]
    v = qkv[:, 2 * D_MODEL:]
    x = x + _attn_core(q, k, v, sa_wo[...], sa_bo[...])

    # residual 1: cross-attention (query = norm(x), key/value = encoder_output)
    xn = _layer_norm(x)
    wqkv = ca_wqkv[...]
    bqkv = ca_bqkv[...]
    q = jnp.dot(xn, wqkv[:, :D_MODEL],
                preferred_element_type=jnp.float32) + bqkv[:, :D_MODEL]
    kv = jnp.dot(enc, wqkv[:, D_MODEL:],
                 preferred_element_type=jnp.float32) + bqkv[:, D_MODEL:]
    k = kv[:, :D_MODEL]
    v = kv[:, D_MODEL:]
    x = x + _attn_core(q, k, v, ca_wo[...], ca_bo[...])

    # residual 2: feed-forward (linear -> relu -> linear)
    xn = _layer_norm(x)
    h = jnp.maximum(
        jnp.dot(xn, ff_w1[...], preferred_element_type=jnp.float32) + ff_b1[...], 0.0
    )
    x = x + jnp.dot(h, ff_w2[...], preferred_element_type=jnp.float32) + ff_b2[...]

    o_ref[0] = x


def decoder_block(x, encoder_output, src_mask, target_mask, packed_params):
    # src_mask / target_mask intentionally unused (see note at top).
    del src_mask, target_mask
    B, S, D = x.shape
    S_src = encoder_output.shape[1]

    in_specs = [
        pl.BlockSpec((1, S, D), lambda b: (b, 0, 0)),
        pl.BlockSpec((1, S_src, D), lambda b: (b, 0, 0)),
    ]
    for p in packed_params:
        in_specs.append(pl.BlockSpec(p.shape, lambda b: (0, 0)))

    return pl.pallas_call(
        decoder_block_kernel,
        out_shape=jax.ShapeDtypeStruct((B, S, D), jnp.float32),
        grid_spec=pltpu.PrefetchScalarGridSpec(
            num_scalar_prefetch=0,
            grid=(B,),
            in_specs=in_specs,
            out_specs=pl.BlockSpec((1, S, D), lambda b: (b, 0, 0)),
        ),
        compiler_params=pltpu.CompilerParams(dimension_semantics=("parallel",)),
    )(x, encoder_output, *packed_params)


# ---------------------------------------------------------------------------
# One-time parameter packing (QKV fusion + 1/sqrt(d_k) constant fold)
# ---------------------------------------------------------------------------
def pack_params(params):
    (sa_wq, sa_bq, sa_wk, sa_bk, sa_wv, sa_bv, sa_wo, sa_bo,
     ca_wq, ca_bq, ca_wk, ca_bk, ca_wv, ca_bv, ca_wo, ca_bo,
     ff_w1, ff_b1, ff_w2, ff_b2) = params
    scale = 1.0 / math.sqrt(D_MODEL)  # d_k == d_model in the reference module

    def pack(wq, bq, wk, bk, wv, bv):
        wqkv = jnp.concatenate([wq * scale, wk, wv], axis=1)   # (D, 3D)
        bqkv = jnp.concatenate([bq * scale, bk, bv], axis=1)   # (1, 3D)
        return wqkv, bqkv

    sa_wqkv, sa_bqkv = pack(sa_wq, sa_bq, sa_wk, sa_bk, sa_wv, sa_bv)
    ca_wqkv, ca_bqkv = pack(ca_wq, ca_bq, ca_wk, ca_bk, ca_wv, ca_bv)
    return [sa_wqkv, sa_bqkv, sa_wo, sa_bo,
            ca_wqkv, ca_bqkv, ca_wo, ca_bo,
            ff_w1, ff_b1, ff_w2, ff_b2]


# ---------------------------------------------------------------------------
# Pure-JAX reference (same math, on the raw unpacked params) for cross-check
# ---------------------------------------------------------------------------
def _ref_decoder_block(x, enc, params):
    (sa_wq, sa_bq, sa_wk, sa_bk, sa_wv, sa_bv, sa_wo, sa_bo,
     ca_wq, ca_bq, ca_wk, ca_bk, ca_wv, ca_bv, ca_wo, ca_bo,
     ff_w1, ff_b1, ff_w2, ff_b2) = params

    def ln(t):
        mean = jnp.mean(t, axis=-1, keepdims=True)
        tm = t - mean
        var = jnp.sum(tm * tm, axis=-1, keepdims=True) / (t.shape[-1] - 1)
        return tm / (jnp.sqrt(var) + EPS) + 1.0

    def attn(q_in, kv_in, wq, bq, wk, bk, wv, bv, wo, bo):
        q = q_in @ wq + bq
        k = kv_in @ wk + bk
        v = kv_in @ wv + bv
        s = jnp.einsum("bqd,bkd->bqk", q, k) / math.sqrt(D_MODEL)
        p = jax.nn.softmax(s, axis=-1)
        return jnp.einsum("bqk,bkd->bqd", p, v) @ wo + bo

    x = x + attn(ln(x), ln(x), sa_wq, sa_bq, sa_wk, sa_bk, sa_wv, sa_bv, sa_wo, sa_bo)
    x = x + attn(ln(x), enc, ca_wq, ca_bq, ca_wk, ca_bk, ca_wv, ca_bv, ca_wo, ca_bo)
    xn = ln(x)
    x = x + jnp.maximum(xn @ ff_w1 + ff_b1, 0.0) @ ff_w2 + ff_b2
    return x


# ---------------------------------------------------------------------------
# Deterministic parameter construction + demo
# ---------------------------------------------------------------------------
def _make_params(key):
    keys = jax.random.split(key, 10)

    def lin(k, din, dout):
        kw, kb = jax.random.split(k)
        w = jax.random.normal(kw, (din, dout), jnp.float32) * 0.05  # already (in, out)
        b = jax.random.normal(kb, (1, dout), jnp.float32) * 0.05
        return w, b

    params = []
    # self-attention: w_q, w_k, w_v, w_o
    for i in range(4):
        w, b = lin(keys[i], D_MODEL, D_MODEL)
        params += [w, b]
    # cross-attention: w_q, w_k, w_v, w_o
    for i in range(4):
        w, b = lin(keys[4 + i], D_MODEL, D_MODEL)
        params += [w, b]
    # feed-forward: linear1 (d_model -> d_ff), linear2 (d_ff -> d_model)
    w1, b1 = lin(keys[8], D_MODEL, D_FF)
    w2, b2 = lin(keys[9], D_FF, D_MODEL)
    params += [w1, b1, w2, b2]
    return params


if __name__ == "__main__":
    key = jax.random.PRNGKey(0)
    kx, kenc, kp = jax.random.split(key, 3)

    x = jax.random.normal(kx, (BATCH, S_TGT, D_MODEL), jnp.float32)
    encoder_output = jax.random.normal(kenc, (BATCH, S_SRC, D_MODEL), jnp.float32)
    # Masks accepted for interface fidelity; semantically no-ops (see note at top).
    target_mask = jnp.tril(jnp.ones((S_TGT, S_TGT), jnp.float32))
    src_mask = jnp.ones((S_TGT, S_SRC), jnp.float32)

    params = _make_params(kp)
    packed = pack_params(params)  # one-time QKV fusion + score-scale fold

    out = decoder_block(x, encoder_output, src_mask, target_mask, packed)
    out = jax.block_until_ready(out)

    ref = _ref_decoder_block(x, encoder_output, params)
    # Tolerance relaxed vs 1e-4 because the kernel uses approx (EUP) reciprocals
    # (~2^-12 relative error) in the layernorm / softmax denominators.
    np.testing.assert_allclose(np.asarray(out), np.asarray(ref), rtol=2e-3, atol=2e-3)

    print("KERNEL_OK")
</pallas_src>

<mosaic_0001>
module attributes {stable_mosaic.version = 11 : i64} {
  func.func @decoder_block_kernel(%arg0: i32, %arg1: memref<1x8x32xf32, #tpu.memory_space<vmem>>, %arg2: memref<1x8x32xf32, #tpu.memory_space<vmem>>, %arg3: memref<32x96xf32, #tpu.memory_space<vmem>>, %arg4: memref<1x96xf32, #tpu.memory_space<vmem>>, %arg5: memref<32x32xf32, #tpu.memory_space<vmem>>, %arg6: memref<1x32xf32, #tpu.memory_space<vmem>>, %arg7: memref<32x96xf32, #tpu.memory_space<vmem>>, %arg8: memref<1x96xf32, #tpu.memory_space<vmem>>, %arg9: memref<32x32xf32, #tpu.memory_space<vmem>>, %arg10: memref<1x32xf32, #tpu.memory_space<vmem>>, %arg11: memref<32x64xf32, #tpu.memory_space<vmem>>, %arg12: memref<1x64xf32, #tpu.memory_space<vmem>>, %arg13: memref<64x32xf32, #tpu.memory_space<vmem>>, %arg14: memref<1x32xf32, #tpu.memory_space<vmem>>, %arg15: memref<1x8x32xf32, #tpu.memory_space<vmem>>) attributes {dimension_semantics = [#tpu.dimension_semantics<parallel>], iteration_bounds = array<i64: 2>, scalar_prefetch = 0 : i64, scratch_operands = 0 : i64, tpu.core_type = #tpu.core_type<tc>, window_params = [{transform_indices = @transform_0, window_bounds = array<i64: 1, 8, 32>}, {transform_indices = @transform_1, window_bounds = array<i64: 1, 8, 32>}, {pipeline_mode = #tpu.pipeline_mode<synchronous>, transform_indices = @transform_2, window_bounds = array<i64: 32, 96>}, {pipeline_mode = #tpu.pipeline_mode<synchronous>, transform_indices = @transform_3, window_bounds = array<i64: 1, 96>}, {pipeline_mode = #tpu.pipeline_mode<synchronous>, transform_indices = @transform_4, window_bounds = array<i64: 32, 32>}, {pipeline_mode = #tpu.pipeline_mode<synchronous>, transform_indices = @transform_5, window_bounds = array<i64: 1, 32>}, {pipeline_mode = #tpu.pipeline_mode<synchronous>, transform_indices = @transform_6, window_bounds = array<i64: 32, 96>}, {pipeline_mode = #tpu.pipeline_mode<synchronous>, transform_indices = @transform_7, window_bounds = array<i64: 1, 96>}, {pipeline_mode = #tpu.pipeline_mode<synchronous>, transform_indices = @transform_8, window_bounds = array<i64: 32, 32>}, {pipeline_mode = #tpu.pipeline_mode<synchronous>, transform_indices = @transform_9, window_bounds = array<i64: 1, 32>}, {pipeline_mode = #tpu.pipeline_mode<synchronous>, transform_indices = @transform_10, window_bounds = array<i64: 32, 64>}, {pipeline_mode = #tpu.pipeline_mode<synchronous>, transform_indices = @transform_11, window_bounds = array<i64: 1, 64>}, {pipeline_mode = #tpu.pipeline_mode<synchronous>, transform_indices = @transform_12, window_bounds = array<i64: 64, 32>}, {pipeline_mode = #tpu.pipeline_mode<synchronous>, transform_indices = @transform_13, window_bounds = array<i64: 1, 32>}, {transform_indices = @transform_14, window_bounds = array<i64: 1, 8, 32>}]} {
    %c0 = arith.constant 0 : index
    %c0_0 = arith.constant 0 : index
    %c0_1 = arith.constant 0 : index
    %0 = vector.load %arg1[%c0, %c0_0, %c0_1] : memref<1x8x32xf32, #tpu.memory_space<vmem>>, vector<1x8x32xf32>
    %1 = vector.shape_cast %0 : vector<1x8x32xf32> to vector<8x32xf32>
    %c0_2 = arith.constant 0 : index
    %c0_3 = arith.constant 0 : index
    %c0_4 = arith.constant 0 : index
    %2 = vector.load %arg2[%c0_2, %c0_3, %c0_4] : memref<1x8x32xf32, #tpu.memory_space<vmem>>, vector<1x8x32xf32>
    %3 = vector.shape_cast %2 : vector<1x8x32xf32> to vector<8x32xf32>
    %cst = arith.constant dense<0.000000e+00> : vector<8xf32>
    %4 = vector.multi_reduction <add>, %1, %cst [1] : vector<8x32xf32> to vector<8xf32>
    %5 = vector.shape_cast %4 : vector<8xf32> to vector<8x1xf32>
    %cst_5 = arith.constant 3.200000e+01 : f32
    %6 = vector.broadcast %cst_5 : f32 to vector<8x1xf32>
    %7 = arith.divf %5, %6 : vector<8x1xf32>
    %8 = vector.broadcast %7 : vector<8x1xf32> to vector<8x32xf32>
    %9 = arith.subf %1, %8 : vector<8x32xf32>
    %10 = arith.mulf %9, %9 : vector<8x32xf32>
    %cst_6 = arith.constant dense<0.000000e+00> : vector<8xf32>
    %11 = vector.multi_reduction <add>, %10, %cst_6 [1] : vector<8x32xf32> to vector<8xf32>
    %12 = vector.shape_cast %11 : vector<8xf32> to vector<8x1xf32>
    %cst_7 = arith.constant 3.100000e+01 : f32
    %13 = vector.broadcast %cst_7 : f32 to vector<8x1xf32>
    %14 = arith.divf %12, %13 : vector<8x1xf32>
    %15 = math.sqrt %14 : vector<8x1xf32>
    %cst_8 = arith.constant 9.99999997E-7 : f32
    %16 = vector.broadcast %cst_8 : f32 to vector<8x1xf32>
    %17 = arith.addf %15, %16 : vector<8x1xf32>
    %18 = tpu.reciprocal %17 {approx = true} : vector<8x1xf32> -> vector<8x1xf32>
    %19 = vector.broadcast %18 : vector<8x1xf32> to vector<8x32xf32>
    %20 = arith.mulf %9, %19 : vector<8x32xf32>
    %cst_9 = arith.constant 1.000000e+00 : f32
    %21 = vector.broadcast %cst_9 : f32 to vector<8x32xf32>
    %22 = arith.addf %20, %21 : vector<8x32xf32>
    %c0_10 = arith.constant 0 : index
    %c0_11 = arith.constant 0 : index
    %23 = vector.load %arg3[%c0_10, %c0_11] : memref<32x96xf32, #tpu.memory_space<vmem>>, vector<32x96xf32>
    %cst_12 = arith.constant dense<0.000000e+00> : vector<8x96xf32>
    %24 = tpu.matmul %22, %23, %cst_12 {dimension_numbers = #tpu.dot_dimension_numbers<[1], [0], [0], [1], [0, 0, 1, 1], [], []>} : vector<8x32xf32>, vector<32x96xf32>, vector<8x96xf32> -> vector<8x96xf32>
    %c0_13 = arith.constant 0 : index
    %c0_14 = arith.constant 0 : index
    %25 = vector.load %arg4[%c0_13, %c0_14] : memref<1x96xf32, #tpu.memory_space<vmem>>, vector<1x96xf32>
    %26 = vector.broadcast %25 : vector<1x96xf32> to vector<8x96xf32>
    %27 = arith.addf %24, %26 : vector<8x96xf32>
    %28 = vector.extract_strided_slice %27 {offsets = [0, 0], sizes = [8, 32], strides = [1, 1]} : vector<8x96xf32> to vector<8x32xf32>
    %29 = vector.extract_strided_slice %27 {offsets = [0, 32], sizes = [8, 32], strides = [1, 1]} : vector<8x96xf32> to vector<8x32xf32>
    %30 = vector.extract_strided_slice %27 {offsets = [0, 64], sizes = [8, 32], strides = [1, 1]} : vector<8x96xf32> to vector<8x32xf32>
    %c0_15 = arith.constant 0 : index
    %c0_16 = arith.constant 0 : index
    %31 = vector.load %arg5[%c0_15, %c0_16] : memref<32x32xf32, #tpu.memory_space<vmem>>, vector<32x32xf32>
    %c0_17 = arith.constant 0 : index
    %c0_18 = arith.constant 0 : index
    %32 = vector.load %arg6[%c0_17, %c0_18] : memref<1x32xf32, #tpu.memory_space<vmem>>, vector<1x32xf32>
    %cst_19 = arith.constant dense<0.000000e+00> : vector<8x8xf32>
    %33 = tpu.matmul %28, %29, %cst_19 {dimension_numbers = #tpu.dot_dimension_numbers<[1], [1], [0], [0], [0, 0, 1, 0], [], []>} : vector<8x32xf32>, vector<8x32xf32>, vector<8x8xf32> -> vector<8x8xf32>
    %cst_20 = arith.constant dense<0xFF800000> : vector<8xf32>
    %34 = vector.multi_reduction <maximumf>, %33, %cst_20 [1] : vector<8x8xf32> to vector<8xf32>
    %35 = vector.shape_cast %34 : vector<8xf32> to vector<8x1xf32>
    %36 = vector.broadcast %35 : vector<8x1xf32> to vector<8x8xf32>
    %37 = arith.subf %33, %36 : vector<8x8xf32>
    %38 = math.exp %37 : vector<8x8xf32>
    %cst_21 = arith.constant dense<0.000000e+00> : vector<8xf32>
    %39 = vector.multi_reduction <add>, %38, %cst_21 [1] : vector<8x8xf32> to vector<8xf32>
    %40 = vector.shape_cast %39 : vector<8xf32> to vector<8x1xf32>
    %41 = tpu.reciprocal %40 {approx = true} : vector<8x1xf32> -> vector<8x1xf32>
    %42 = vector.broadcast %41 : vector<8x1xf32> to vector<8x8xf32>
    %43 = arith.mulf %38, %42 : vector<8x8xf32>
    %cst_22 = arith.constant dense<0.000000e+00> : vector<8x32xf32>
    %44 = tpu.matmul %43, %30, %cst_22 {dimension_numbers = #tpu.dot_dimension_numbers<[1], [0], [0], [1], [0, 0, 1, 1], [], []>} : vector<8x8xf32>, vector<8x32xf32>, vector<8x32xf32> -> vector<8x32xf32>
    %cst_23 = arith.constant dense<0.000000e+00> : vector<8x32xf32>
    %45 = tpu.matmul %44, %31, %cst_23 {dimension_numbers = #tpu.dot_dimension_numbers<[1], [0], [0], [1], [0, 0, 1, 1], [], []>} : vector<8x32xf32>, vector<32x32xf32>, vector<8x32xf32> -> vector<8x32xf32>
    %46 = vector.broadcast %32 : vector<1x32xf32> to vector<8x32xf32>
    %47 = arith.addf %45, %46 : vector<8x32xf32>
    %48 = arith.addf %1, %47 : vector<8x32xf32>
    %cst_24 = arith.constant dense<0.000000e+00> : vector<8xf32>
    %49 = vector.multi_reduction <add>, %48, %cst_24 [1] : vector<8x32xf32> to vector<8xf32>
    %50 = vector.shape_cast %49 : vector<8xf32> to vector<8x1xf32>
    %cst_25 = arith.constant 3.200000e+01 : f32
    %51 = vector.broadcast %cst_25 : f32 to vector<8x1xf32>
    %52 = arith.divf %50, %51 : vector<8x1xf32>
    %53 = vector.broadcast %52 : vector<8x1xf32> to vector<8x32xf32>
    %54 = arith.subf %48, %53 : vector<8x32xf32>
    %55 = arith.mulf %54, %54 : vector<8x32xf32>
    %cst_26 = arith.constant dense<0.000000e+00> : vector<8xf32>
    %56 = vector.multi_reduction <add>, %55, %cst_26 [1] : vector<8x32xf32> to vector<8xf32>
    %57 = vector.shape_cast %56 : vector<8xf32> to vector<8x1xf32>
    %cst_27 = arith.constant 3.100000e+01 : f32
    %58 = vector.broadcast %cst_27 : f32 to vector<8x1xf32>
    %59 = arith.divf %57, %58 : vector<8x1xf32>
    %60 = math.sqrt %59 : vector<8x1xf32>
    %cst_28 = arith.constant 9.99999997E-7 : f32
    %61 = vector.broadcast %cst_28 : f32 to vector<8x1xf32>
    %62 = arith.addf %60, %61 : vector<8x1xf32>
    %63 = tpu.reciprocal %62 {approx = true} : vector<8x1xf32> -> vector<8x1xf32>
    %64 = vector.broadcast %63 : vector<8x1xf32> to vector<8x32xf32>
    %65 = arith.mulf %54, %64 : vector<8x32xf32>
    %cst_29 = arith.constant 1.000000e+00 : f32
    %66 = vector.broadcast %cst_29 : f32 to vector<8x32xf32>
    %67 = arith.addf %65, %66 : vector<8x32xf32>
    %c0_30 = arith.constant 0 : index
    %c0_31 = arith.constant 0 : index
    %68 = vector.load %arg7[%c0_30, %c0_31] : memref<32x96xf32, #tpu.memory_space<vmem>>, vector<32x96xf32>
    %c0_32 = arith.constant 0 : index
    %c0_33 = arith.constant 0 : index
    %69 = vector.load %arg8[%c0_32, %c0_33] : memref<1x96xf32, #tpu.memory_space<vmem>>, vector<1x96xf32>
    %70 = vector.extract_strided_slice %68 {offsets = [0, 0], sizes = [32, 32], strides = [1, 1]} : vector<32x96xf32> to vector<32x32xf32>
    %cst_34 = arith.constant dense<0.000000e+00> : vector<8x32xf32>
    %71 = tpu.matmul %67, %70, %cst_34 {dimension_numbers = #tpu.dot_dimension_numbers<[1], [0], [0], [1], [0, 0, 1, 1], [], []>} : vector<8x32xf32>, vector<32x32xf32>, vector<8x32xf32> -> vector<8x32xf32>
    %72 = vector.extract_strided_slice %69 {offsets = [0, 0], sizes = [1, 32], strides = [1, 1]} : vector<1x96xf32> to vector<1x32xf32>
    %73 = vector.broadcast %72 : vector<1x32xf32> to vector<8x32xf32>
    %74 = arith.addf %71, %73 : vector<8x32xf32>
    %75 = vector.extract_strided_slice %68 {offsets = [0, 32], sizes = [32, 64], strides = [1, 1]} : vector<32x96xf32> to vector<32x64xf32>
    %cst_35 = arith.constant dense<0.000000e+00> : vector<8x64xf32>
    %76 = tpu.matmul %3, %75, %cst_35 {dimension_numbers = #tpu.dot_dimension_numbers<[1], [0], [0], [1], [0, 0, 1, 1], [], []>} : vector<8x32xf32>, vector<32x64xf32>, vector<8x64xf32> -> vector<8x64xf32>
    %77 = vector.extract_strided_slice %69 {offsets = [0, 32], sizes = [1, 64], strides = [1, 1]} : vector<1x96xf32> to vector<1x64xf32>
    %78 = vector.broadcast %77 : vector<1x64xf32> to vector<8x64xf32>
    %79 = arith.addf %76, %78 : vector<8x64xf32>
    %80 = vector.extract_strided_slice %79 {offsets = [0, 0], sizes = [8, 32], strides = [1, 1]} : vector<8x64xf32> to vector<8x32xf32>
    %81 = vector.extract_strided_slice %79 {offsets = [0, 32], sizes = [8, 32], strides = [1, 1]} : vector<8x64xf32> to vector<8x32xf32>
    %c0_36 = arith.constant 0 : index
    %c0_37 = arith.constant 0 : index
    %82 = vector.load %arg9[%c0_36, %c0_37] : memref<32x32xf32, #tpu.memory_space<vmem>>, vector<32x32xf32>
    %c0_38 = arith.constant 0 : index
    %c0_39 = arith.constant 0 : index
    %83 = vector.load %arg10[%c0_38, %c0_39] : memref<1x32xf32, #tpu.memory_space<vmem>>, vector<1x32xf32>
    %cst_40 = arith.constant dense<0.000000e+00> : vector<8x8xf32>
    %84 = tpu.matmul %74, %80, %cst_40 {dimension_numbers = #tpu.dot_dimension_numbers<[1], [1], [0], [0], [0, 0, 1, 0], [], []>} : vector<8x32xf32>, vector<8x32xf32>, vector<8x8xf32> -> vector<8x8xf32>
    %cst_41 = arith.constant dense<0xFF800000> : vector<8xf32>
    %85 = vector.multi_reduction <maximumf>, %84, %cst_41 [1] : vector<8x8xf32> to vector<8xf32>
    %86 = vector.shape_cast %85 : vector<8xf32> to vector<8x1xf32>
    %87 = vector.broadcast %86 : vector<8x1xf32> to vector<8x8xf32>
    %88 = arith.subf %84, %87 : vector<8x8xf32>
    %89 = math.exp %88 : vector<8x8xf32>
    %cst_42 = arith.constant dense<0.000000e+00> : vector<8xf32>
    %90 = vector.multi_reduction <add>, %89, %cst_42 [1] : vector<8x8xf32> to vector<8xf32>
    %91 = vector.shape_cast %90 : vector<8xf32> to vector<8x1xf32>
    %92 = tpu.reciprocal %91 {approx = true} : vector<8x1xf32> -> vector<8x1xf32>
    %93 = vector.broadcast %92 : vector<8x1xf32> to vector<8x8xf32>
    %94 = arith.mulf %89, %93 : vector<8x8xf32>
    %cst_43 = arith.constant dense<0.000000e+00> : vector<8x32xf32>
    %95 = tpu.matmul %94, %81, %cst_43 {dimension_numbers = #tpu.dot_dimension_numbers<[1], [0], [0], [1], [0, 0, 1, 1], [], []>} : vector<8x8xf32>, vector<8x32xf32>, vector<8x32xf32> -> vector<8x32xf32>
    %cst_44 = arith.constant dense<0.000000e+00> : vector<8x32xf32>
    %96 = tpu.matmul %95, %82, %cst_44 {dimension_numbers = #tpu.dot_dimension_numbers<[1], [0], [0], [1], [0, 0, 1, 1], [], []>} : vector<8x32xf32>, vector<32x32xf32>, vector<8x32xf32> -> vector<8x32xf32>
    %97 = vector.broadcast %83 : vector<1x32xf32> to vector<8x32xf32>
    %98 = arith.addf %96, %97 : vector<8x32xf32>
    %99 = arith.addf %48, %98 : vector<8x32xf32>
    %cst_45 = arith.constant dense<0.000000e+00> : vector<8xf32>
    %100 = vector.multi_reduction <add>, %99, %cst_45 [1] : vector<8x32xf32> to vector<8xf32>
    %101 = vector.shape_cast %100 : vector<8xf32> to vector<8x1xf32>
    %cst_46 = arith.constant 3.200000e+01 : f32
    %102 = vector.broadcast %cst_46 : f32 to vector<8x1xf32>
    %103 = arith.divf %101, %102 : vector<8x1xf32>
    %104 = vector.broadcast %103 : vector<8x1xf32> to vector<8x32xf32>
    %105 = arith.subf %99, %104 : vector<8x32xf32>
    %106 = arith.mulf %105, %105 : vector<8x32xf32>
    %cst_47 = arith.constant dense<0.000000e+00> : vector<8xf32>
    %107 = vector.multi_reduction <add>, %106, %cst_47 [1] : vector<8x32xf32> to vector<8xf32>
    %108 = vector.shape_cast %107 : vector<8xf32> to vector<8x1xf32>
    %cst_48 = arith.constant 3.100000e+01 : f32
    %109 = vector.broadcast %cst_48 : f32 to vector<8x1xf32>
    %110 = arith.divf %108, %109 : vector<8x1xf32>
    %111 = math.sqrt %110 : vector<8x1xf32>
    %cst_49 = arith.constant 9.99999997E-7 : f32
    %112 = vector.broadcast %cst_49 : f32 to vector<8x1xf32>
    %113 = arith.addf %111, %112 : vector<8x1xf32>
    %114 = tpu.reciprocal %113 {approx = true} : vector<8x1xf32> -> vector<8x1xf32>
    %115 = vector.broadcast %114 : vector<8x1xf32> to vector<8x32xf32>
    %116 = arith.mulf %105, %115 : vector<8x32xf32>
    %cst_50 = arith.constant 1.000000e+00 : f32
    %117 = vector.broadcast %cst_50 : f32 to vector<8x32xf32>
    %118 = arith.addf %116, %117 : vector<8x32xf32>
    %c0_51 = arith.constant 0 : index
    %c0_52 = arith.constant 0 : index
    %119 = vector.load %arg11[%c0_51, %c0_52] : memref<32x64xf32, #tpu.memory_space<vmem>>, vector<32x64xf32>
    %cst_53 = arith.constant dense<0.000000e+00> : vector<8x64xf32>
    %120 = tpu.matmul %118, %119, %cst_53 {dimension_numbers = #tpu.dot_dimension_numbers<[1], [0], [0], [1], [0, 0, 1, 1], [], []>} : vector<8x32xf32>, vector<32x64xf32>, vector<8x64xf32> -> vector<8x64xf32>
    %c0_54 = arith.constant 0 : index
    %c0_55 = arith.constant 0 : index
    %121 = vector.load %arg12[%c0_54, %c0_55] : memref<1x64xf32, #tpu.memory_space<vmem>>, vector<1x64xf32>
    %122 = vector.broadcast %121 : vector<1x64xf32> to vector<8x64xf32>
    %123 = arith.addf %120, %122 : vector<8x64xf32>
    %cst_56 = arith.constant 0.000000e+00 : f32
    %124 = vector.broadcast %cst_56 : f32 to vector<8x64xf32>
    %125 = arith.maximumf %123, %124 : vector<8x64xf32>
    %c0_57 = arith.constant 0 : index
    %c0_58 = arith.constant 0 : index
    %126 = vector.load %arg13[%c0_57, %c0_58] : memref<64x32xf32, #tpu.memory_space<vmem>>, vector<64x32xf32>
    %cst_59 = arith.constant dense<0.000000e+00> : vector<8x32xf32>
    %127 = tpu.matmul %125, %126, %cst_59 {dimension_numbers = #tpu.dot_dimension_numbers<[1], [0], [0], [1], [0, 0, 1, 1], [], []>} : vector<8x64xf32>, vector<64x32xf32>, vector<8x32xf32> -> vector<8x32xf32>
    %128 = arith.addf %99, %127 : vector<8x32xf32>
    %c0_60 = arith.constant 0 : index
    %c0_61 = arith.constant 0 : index
    %129 = vector.load %arg14[%c0_60, %c0_61] : memref<1x32xf32, #tpu.memory_space<vmem>>, vector<1x32xf32>
    %130 = vector.broadcast %129 : vector<1x32xf32> to vector<8x32xf32>
    %131 = arith.addf %128, %130 : vector<8x32xf32>
    %c0_62 = arith.constant 0 : index
    %c0_63 = arith.constant 0 : index
    %c0_64 = arith.constant 0 : index
    %132 = vector.load %arg15[%c0_62, %c0_63, %c0_64] : memref<1x8x32xf32, #tpu.memory_space<vmem>>, vector<1x8x32xf32>
    %133 = vector.shape_cast %132 : vector<1x8x32xf32> to vector<8x32xf32>
    %134 = vector.shape_cast %131 : vector<8x32xf32> to vector<1x8x32xf32>
    tpu.vector_store %arg15[%c0_62, %c0_63, %c0_64], %134 {strides = array<i32>} : memref<1x8x32xf32, #tpu.memory_space<vmem>>, vector<1x8x32xf32>,
    return
  }
  func.func @transform_0(%arg0: i32) -> (i32, i32, i32) {
    %c0_i32 = arith.constant 0 : i32
    %c0_i32_0 = arith.constant 0 : i32
    %c0_i32_1 = arith.constant 0 : i32
    return %arg0, %c0_i32, %c0_i32_0 : i32, i32, i32
  }
  func.func @transform_1(%arg0: i32) -> (i32, i32, i32) {
    %c0_i32 = arith.constant 0 : i32
    %c0_i32_0 = arith.constant 0 : i32
    %c0_i32_1 = arith.constant 0 : i32
    return %arg0, %c0_i32, %c0_i32_0 : i32, i32, i32
  }
  func.func @transform_2(%arg0: i32) -> (i32, i32) {
    %c0_i32 = arith.constant 0 : i32
    %c0_i32_0 = arith.constant 0 : i32
    %c0_i32_1 = arith.constant 0 : i32
    return %c0_i32, %c0_i32_0 : i32, i32
  }
  func.func @transform_3(%arg0: i32) -> (i32, i32) {
    %c0_i32 = arith.constant 0 : i32
    %c0_i32_0 = arith.constant 0 : i32
    %c0_i32_1 = arith.constant 0 : i32
    return %c0_i32, %c0_i32_0 : i32, i32
  }
  func.func @transform_4(%arg0: i32) -> (i32, i32) {
    %c0_i32 = arith.constant 0 : i32
    %c0_i32_0 = arith.constant 0 : i32
    %c0_i32_1 = arith.constant 0 : i32
    return %c0_i32, %c0_i32_0 : i32, i32
  }
  func.func @transform_5(%arg0: i32) -> (i32, i32) {
    %c0_i32 = arith.constant 0 : i32
    %c0_i32_0 = arith.constant 0 : i32
    %c0_i32_1 = arith.constant 0 : i32
    return %c0_i32, %c0_i32_0 : i32, i32
  }
  func.func @transform_6(%arg0: i32) -> (i32, i32) {
    %c0_i32 = arith.constant 0 : i32
    %c0_i32_0 = arith.constant 0 : i32
    %c0_i32_1 = arith.constant 0 : i32
    return %c0_i32, %c0_i32_0 : i32, i32
  }
  func.func @transform_7(%arg0: i32) -> (i32, i32) {
    %c0_i32 = arith.constant 0 : i32
    %c0_i32_0 = arith.constant 0 : i32
    %c0_i32_1 = arith.constant 0 : i32
    return %c0_i32, %c0_i32_0 : i32, i32
  }
  func.func @transform_8(%arg0: i32) -> (i32, i32) {
    %c0_i32 = arith.constant 0 : i32
    %c0_i32_0 = arith.constant 0 : i32
    %c0_i32_1 = arith.constant 0 : i32
    return %c0_i32, %c0_i32_0 : i32, i32
  }
  func.func @transform_9(%arg0: i32) -> (i32, i32) {
    %c0_i32 = arith.constant 0 : i32
    %c0_i32_0 = arith.constant 0 : i32
    %c0_i32_1 = arith.constant 0 : i32
    return %c0_i32, %c0_i32_0 : i32, i32
  }
  func.func @transform_10(%arg0: i32) -> (i32, i32) {
    %c0_i32 = arith.constant 0 : i32
    %c0_i32_0 = arith.constant 0 : i32
    %c0_i32_1 = arith.constant 0 : i32
    return %c0_i32, %c0_i32_0 : i32, i32
  }
  func.func @transform_11(%arg0: i32) -> (i32, i32) {
    %c0_i32 = arith.constant 0 : i32
    %c0_i32_0 = arith.constant 0 : i32
    %c0_i32_1 = arith.constant 0 : i32
    return %c0_i32, %c0_i32_0 : i32, i32
  }
  func.func @transform_12(%arg0: i32) -> (i32, i32) {
    %c0_i32 = arith.constant 0 : i32
    %c0_i32_0 = arith.constant 0 : i32
    %c0_i32_1 = arith.constant 0 : i32
    return %c0_i32, %c0_i32_0 : i32, i32
  }
  func.func @transform_13(%arg0: i32) -> (i32, i32) {
    %c0_i32 = arith.constant 0 : i32
    %c0_i32_0 = arith.constant 0 : i32
    %c0_i32_1 = arith.constant 0 : i32
    return %c0_i32, %c0_i32_0 : i32, i32
  }
  func.func @transform_14(%arg0: i32) -> (i32, i32, i32) {
    %c0_i32 = arith.constant 0 : i32
    %c0_i32_0 = arith.constant 0 : i32
    %c0_i32_1 = arith.constant 0 : i32
    return %arg0, %c0_i32, %c0_i32_0 : i32, i32, i32
  }
}

</mosaic_0001>

<bundles_post_ra>
// kernel: tpu_custom_call.1
= control target key start
LH: loop header
LB: loop body
LE: loop exit
PB: predicated region body
PF: predicated region fallthrough
CT: control target
= control target key end

     0   :  { %s2747_s0 = inlined_call_operand.hbm [shape: f32[2,8,32], index: 0, kind: input, shape index: {}]   ;;  %s2748_s1 = inlined_call_operand.hbm [shape: f32[2,8,32], index: 1, kind: input, shape index: {}]   ;;  %s2749_s2 = inlined_call_operand.vmem [shape: f32[32,96], index: 2, kind: input, shape index: {}]   ;;  %s2750_s3 = inlined_call_operand.vmem [shape: f32[1,96], index: 3, kind: input, shape index: {}]   ;;  %s2751_s4 = inlined_call_operand.vmem [shape: f32[32,32], index: 4, kind: input, shape index: {}]   ;;  %s2752_s5 = inlined_call_operand.vmem [shape: f32[1,32], index: 5, kind: input, shape index: {}]   ;;  %s2753_s6 = inlined_call_operand.vmem [shape: f32[32,96], index: 6, kind: input, shape index: {}]   ;;  %s2754_s7 = inlined_call_operand.vmem [shape: f32[1,96], index: 7, kind: input, shape index: {}]   ;;  %s2755_s8 = inlined_call_operand.hbm [shape: f32[32,32], index: 8, kind: input, shape index: {}]   ;;  %s2756_s9 = inlined_call_operand.vmem [shape: f32[1,32], index: 9, kind: input, shape index: {}]   ;;  %s2757_s10 = inlined_call_operand.hbm [shape: f32[32,64], index: 10, kind: input, shape index: {}]   ;;  %s2758_s11 = inlined_call_operand.vmem [shape: f32[1,64], index: 11, kind: input, shape index: {}]   ;;  %s2759_s12 = inlined_call_operand.vmem [shape: f32[64,32], index: 12, kind: input, shape index: {}]   ;;  %s2760_s13 = inlined_call_operand.vmem [shape: f32[1,32], index: 13, kind: input, shape index: {}]   ;;  %s2761_s14 = inlined_call_operand.hbm [shape: f32[2,8,32], index: 14, kind: output, shape index: {}]  }
   0x1   :  { %2773 = sst [smem:[#allocation21_spill]] %s2755_s8 }
   0x2   :  { %2774 = sst [smem:[#allocation22_spill]] %s2757_s10 }
   0x3   :  { %2775 = sst [smem:[#allocation23_spill]] %s2758_s11 }
   0x4   :  { %2776 = sst [smem:[#allocation24_spill]] %s2759_s12 }
   0x5   :  { %2777 = sst [smem:[#allocation25_spill]] %s2760_s13 }
   0x6   :  { %2778 = sst [smem:[#allocation26_spill]] %s2761_s14 }
   0x7   :  { %19 = vsyncpa [#allocation3], 0 }
   0x8   :  { %21 = vsyncpa [#allocation3 + $0x1], 0 }
   0x9   :  { %22 = vsyncpa [#allocation6], 0 }
   0xa   :  { %24 = vsyncpa [#allocation6 + $0x1], 0 }
   0xb   :  { %25 = vsyncpa [#allocation9], 0 }
   0xc   :  { %26 = vsyncpa [#allocation4], 0 }
   0xd   :  { %28 = vsyncpa [#allocation4 + $0x1], 0  ;;  %s2308_s29 = smov 0   ;;  %s2310_s30 = smov 0  }
   0xe   :  { %s2312_s15 = smov 0   ;;  %s2314_s16 = smov 0  }
   0xf LB: > { %2779 = sst [smem:[#allocation16_spill]] %s2207_s29  ;;  %s2329_s17 = sadd.s32 4294967295, %s2219_s16   ;;  %s2219_s16 = sphi %s2314_s16, %s2808_s16   ;;  %s2215_s15 = sphi %s2312_s15, %s2810_s15   ;;  %s2211_s30 = sphi %s2310_s30, %s2812_s30   ;;  %s2207_s29 = sphi %s2308_s29, %s2811_s29  }
  0x10   : > { %2780 = sst [smem:[#allocation17_spill]] %s2215_s15  ;;  %s1678_s18 = sadd.s32 4294967294, %s2219_s16  }
  0x11   : > { %p54_p0 = scmp.ne.s32.totalorder %s2211_s30, %s2207_s29  ;;  %p2765_p1 = scmp.eq.s32.totalorder %s2329_s17, 0 }
  0x12   : > { %p362_p3 = scmp.eq.s32.totalorder %s1678_s18, 1  ;;  %p1679_p5 = scmp.ge.s32.totalorder %s2219_s16, 1 }
  0x13   : > { %p2338_p4 = por %p2765_p1, %p54_p0  ;;  %p369_p7 = scmp.lt.s32.totalorder %s2219_s16, 3 }
  0x14   : > { %p2343_p6 = por %p362_p3, %p54_p0  ;;  %s2221_s22 = smov [#allocation7]  }
  0x15   : > { %s2781_s19 = scalar_select %p2338_p4, 1, 0 }
  0x16   : > { %s2782_s20 = scalar_select %p2343_p6, 1, 0 }
  0x17   : > { %p2348_p8 = pnand %p1679_p5, %p369_p7  ;;  %s399_s23 = sshll.u32 %s2221_s22, 4  ;;  %s2352_s23 = int_to_ptr.vmem [resolvable:$true] %s399_s23 }
  0x18   : > { %2783 = sst [smem:[#allocation18_spill]] %s2782_s20  ;;  %s2222_s25 = smov [#allocation8]  }
  0x19   : > { %s2784_s21 = scalar_select %p2348_p8, 1, 0 }
  0x1a   : > { %p1930_p9 = pneg %p2348_p8  ;;  %s415_s26 = sshll.u32 %s2222_s25, 4  ;;  %s2363_s26 = int_to_ptr.vmem [resolvable:$true] %s415_s26 }
  0x1b   : > { %s2786_s8 = sld [smem:[#allocation21_spill]] }
  0x1c   : > { %p2359_p11 = pnand %p1930_p9, %p2765_p1 }
  0x1e   : > { %p2027_p13 = pneg %p2359_p11 }
  0x21   : > { %s2025_s18 = scalar_lea.hbm %s2786_s8, 512 }
  0x22   : > { %p2026_p12 = scmp.ne.s32.totalorder %s2786_s8, %s2025_s18  ;;  %p2032_p5 = scmp.lt.u32.totalorder %s2025_s18, %s2786_s8 }
  0x24   : > { %p2028_p0 = pnand %p2027_p13, %p2026_p12 }
  0x26   : > { %p2029_p3 = pneg %p2028_p0 }
  0x28   : > { %p2034_p7 = pnand %p2032_p5, %p2029_p3 }
  0x2a   : > { %2037 = shalt.err (!%p2034_p7)
}
  0x2b   : > { %s2038_s25 = scalar_lea.vmem %s2352_s23, 512  ;;  %p2046_p2 = scmp.lt.s32.totalorder %s2352_s23, %s2352_s23 }
  0x2c   : > { %p2039_p9 = scmp.ne.s32.totalorder %s2352_s23, %s2038_s25  ;;  %p2047_p12 = scmp.lt.s32.totalorder %s2038_s25, %s2038_s25 }
  0x2e   : > { %p2041_p10 = pnand %p2039_p9, %p2027_p13  ;;  %p2048_p0 = por %p2047_p12, %p2046_p2 }
  0x30   : > { %p2042_p1 = pneg %p2041_p10 }
  0x32   : > { %p2049_p6 = pnand %p2048_p0, %p2042_p1 }
  0x34   : > { %2052 = shalt.err (!%p2049_p6)
}
  0x35   : > { %s2223_s14 = smov 128   ;;  %s2224_s29 = smov 8  }
  0x36   : > { %1933 = dma.hbm_to_vmem [thread:$0]  (!%p2359_p11), %s2786_s8, 512, %s2352_s23, [#allocation6], %s2223_s14, %s2223_s14, %s2224_s29  }
  0x37   : > { %s2787_s10 = sld [smem:[#allocation22_spill]] }
  0x3d   : > { %s2053_s22 = scalar_lea.hbm %s2787_s10, 512 }
  0x3e   : > { %p2054_p2 = scmp.ne.s32.totalorder %s2787_s10, %s2053_s22  ;;  %p2060_p10 = scmp.lt.u32.totalorder %s2053_s22, %s2787_s10 }
  0x40   : > { %p2056_p1 = pnand %p2054_p2, %p2027_p13 }
  0x42   : > { %p2057_p6 = pneg %p2056_p1 }
  0x44   : > { %p2062_p3 = pnand %p2060_p10, %p2057_p6 }
  0x46   : > { %2065 = shalt.err (!%p2062_p3)
}
  0x47   : > { %s2066_s23 = scalar_lea.vmem %s2363_s26, 512  ;;  %p2074_p12 = scmp.lt.s32.totalorder %s2363_s26, %s2363_s26 }
  0x48   : > { %p2067_p5 = scmp.ne.s32.totalorder %s2363_s26, %s2066_s23  ;;  %p2075_p0 = scmp.lt.s32.totalorder %s2066_s23, %s2066_s23 }
  0x4a   : > { %p2069_p7 = pnand %p2067_p5, %p2027_p13  ;;  %p2076_p2 = por %p2075_p0, %p2074_p12 }
  0x4c   : > { %p2070_p9 = pneg %p2069_p7 }
  0x4e   : > { %p2077_p1 = pnand %p2076_p2, %p2070_p9 }
  0x50   : > { %2080 = shalt.err (!%p2077_p1)
}
  0x51   : > { %1936 = dma.hbm_to_vmem [thread:$0]  (!%p2359_p11), %s2787_s10, 512, %s2363_s26, [#allocation9], %s2223_s14, %s2223_s14, %s2224_s29  }
  0x52   : > { %s2418_s13 = sadd.s32 1, %s2219_s16   ;;  %s41_s24 = sadd.s32 1, %s2215_s15 }
  0x53   : > { %2788 = sst [smem:[#allocation19_spill]] %s2418_s13  ;;  %s38_s20 = ssub.s32 %s2219_s16, %s2418_s13 }
  0x54   : > { %p48_p13 = scmp.ne.s32.totalorder %s2215_s15, %s2211_s30  ;;  %p39_p6 = scmp.eq.s32.totalorder %s38_s20, 0 }
  0x55   : > { %p49_p10 = scmp.eq.s32.totalorder %s2219_s16, 0  ;;  %p2789_p3 = scmp.eq.s32.totalorder %s2329_s17, 1 }
  0x56   : > { %p1950_p7 = scmp.lt.s32.totalorder %s2219_s16, 2  ;;  %s438_s18 = sand.u32 1, %s2215_s15  }
  0x57   : > { %p2428_p5 = por %p2789_p3, %p48_p13  ;;  %p50_p9 = por %p49_p10, %p48_p13 }
  0x58   : > { %s2434_s28 = scalar_select %p39_p6, %s2215_s15, %s41_s24  }
  0x59   : > { %s2790_s27 = scalar_select %p2428_p5, 1, 0 }
  0x5a   : > { %2791 = sst [smem:[#allocation20_spill]] %s2434_s28  ;;  %s2437_s26 = sshll.u32 %s438_s18, 3 }
  0x5b   : > { %s1684_s14 = sshll.u32 %s2219_s16, 7  ;;  %s442_s23 = scalar_lea.vmem [#allocation2], %s2437_s26 }
  0x5c   : > { %s2443_s25 = scalar_lea.hbm %s2747_s0, %s1684_s14  ;;  %s449_s11 = sshll.u32 %s442_s23, 4  ;;  %s2446_s11 = int_to_ptr.vmem [resolvable:$true] %s449_s11 }
  0x5d   : > { %p2448_p11 = pnand %p1950_p7, %p50_p9  ;;  %s2455_s29 = scalar_lea.hbm %s2748_s1, %s1684_s14 }
  0x5e   : > { %s456_s22 = sand.u32 1, %s2219_s16   ;;  %s439_s8 = scalar_lea.sflag [#allocation3], %s438_s18 }
  0x5f   : > { %s2081_s10 = scalar_lea.hbm %s2443_s25, 128  ;;  %p2083_p0 = pneg %p2448_p11 }
  0x60   : > { %p2082_p12 = scmp.ne.s32.totalorder %s2443_s25, %s2081_s10  ;;  %s2086_s15 = scalar_lea.hbm %s2747_s0, 256 }
  0x61   : > { %p2087_p13 = scmp.lt.u32.totalorder %s2443_s25, %s2747_s0  ;;  %p2088_p6 = scmp.lt.u32.totalorder %s2086_s15, %s2081_s10 }
  0x62   : > { %p2084_p2 = pnand %p2083_p0, %p2082_p12  ;;  %p2090_p3 = scmp.lt.u32.totalorder %s2081_s10, %s2443_s25 }
  0x63   : > { %p2089_p10 = por %p2088_p6, %p2087_p13 }
  0x64   : > { %p2085_p1 = pneg %p2084_p2 }
  0x65   : > { %p2091_p7 = por %p2090_p3, %p2089_p10 }
  0x67   : > { %p2092_p9 = pnand %p2091_p7, %p2085_p1 }
  0x69   : > { %2095 = shalt.err (!%p2092_p9)
}
  0x6a   : > { %s2096_s18 = scalar_lea.vmem %s2446_s11, 128  ;;  %s2225_s28 = smov [#allocation2]  }
  0x6b   : > { %p2097_p12 = scmp.ne.s32.totalorder %s2446_s11, %s2096_s18  ;;  %s2101_s14 = sshll.u32 %s2225_s28, 4  ;;  %s2102_s14 = int_to_ptr.vmem [resolvable:$false] %s2101_s14 }
  0x6c   : > { %s2103_s13 = scalar_lea.vmem %s2102_s14, 256  ;;  %p2104_p4 = scmp.lt.s32.totalorder %s2446_s11, %s2102_s14 }
  0x6d   : > { %p2099_p2 = pnand %p2097_p12, %p2083_p0  ;;  %p2105_p13 = scmp.lt.s32.totalorder %s2103_s13, %s2096_s18 }
  0x6f   : > { %p2100_p5 = pneg %p2099_p2  ;;  %p2106_p6 = por %p2105_p13, %p2104_p4 }
  0x71   : > { %p2107_p10 = pnand %p2106_p6, %p2100_p5 }
  0x73   : > { %2110 = shalt.err (!%p2107_p10)
}
  0x74   : > { %1940 = dma.hbm_to_vmem [thread:$0]  (!%p2448_p11), %s2443_s25, 128, %s2446_s11, %s439_s8  }
  0x75   : > { %s460_s10 = scalar_lea.vmem [#allocation5], %s2437_s26  ;;  %s457_s20 = scalar_lea.sflag [#allocation6], %s456_s22 }
  0x76   : > { %s467_s15 = sshll.u32 %s460_s10, 4  ;;  %s2111_s23 = scalar_lea.hbm %s2455_s29, 128  ;;  %s468_s15 = int_to_ptr.vmem [resolvable:$true] %s467_s15 }
  0x77   : > { %p2112_p4 = scmp.ne.s32.totalorder %s2455_s29, %s2111_s23  ;;  %s2116_s28 = scalar_lea.hbm %s2748_s1, 256 }
  0x78   : > { %p2117_p3 = scmp.lt.u32.totalorder %s2455_s29, %s2748_s1  ;;  %p2118_p7 = scmp.lt.u32.totalorder %s2116_s28, %s2111_s23 }
  0x79   : > { %p2114_p5 = pnand %p2112_p4, %p2083_p0  ;;  %p2120_p12 = scmp.lt.u32.totalorder %s2111_s23, %s2455_s29 }
  0x7a   : > { %p2119_p9 = por %p2118_p7, %p2117_p3 }
  0x7b   : > { %p2115_p1 = pneg %p2114_p5 }
  0x7c   : > { %p2121_p2 = por %p2120_p12, %p2119_p9 }
  0x7e   : > { %p2122_p13 = pnand %p2121_p2, %p2115_p1 }
  0x80   : > { %2125 = shalt.err (!%p2122_p13)
}
  0x81   : > { %s2126_s8 = scalar_lea.vmem %s468_s15, 128  ;;  %s2226_s26 = smov [#allocation5]  }
  0x82   : > { %p2127_p6 = scmp.ne.s32.totalorder %s468_s15, %s2126_s8  ;;  %s2131_s25 = sshll.u32 %s2226_s26, 4  ;;  %s2132_s25 = int_to_ptr.vmem [resolvable:$false] %s2131_s25 }
  0x83   : > { %s2133_s11 = scalar_lea.vmem %s2132_s25, 256  ;;  %p2134_p5 = scmp.lt.s32.totalorder %s468_s15, %s2132_s25 }
  0x84   : > { %p2129_p10 = pnand %p2127_p6, %p2083_p0  ;;  %p2135_p8 = scmp.lt.s32.totalorder %s2133_s11, %s2126_s8 }
  0x86   : > { %p2130_p4 = pneg %p2129_p10  ;;  %p2136_p3 = por %p2135_p8, %p2134_p5 }
  0x88   : > { %p2137_p7 = pnand %p2136_p3, %p2130_p4 }
  0x8a   : > { %2140 = shalt.err (!%p2137_p7)
}
  0x8b   : > { %1943 = dma.hbm_to_vmem [thread:$0]  (!%p2448_p11), %s2455_s29, 128, %s468_s15, %s457_s20  }
  0x8c   : > { %p2793_p1 = scmp.ne.s32.totalorder %s2784_s21, 0 }
  0x8d   : > { %s2508_s22 = sand.u32 (!%p2793_p1), 1, %s2211_s30   ;;  %p2794_p8 = scmp.ne.s32.totalorder (!%p2793_p1), %s2781_s19, 0 }
  0x8e   : > { %476 = sbr.rel (%p2793_p1) target bundleno = 4039 (0xfc7), region = 76  ;;  %s2511_s10 = sshll.u32 (!%p2793_p1), %s2508_s22, 3 }
  0x8f   : > { %s479_s23 = scalar_lea.sflag (!%p2793_p1), [#allocation3], %s2508_s22  ;;  %s482_s24 = scalar_lea.vmem (!%p2793_p1), [#allocation2], %s2511_s10 }
  0x95   : > { %2186 = dma.done.wait (%p2794_p8), %s479_s23, 128  }
  0x96   : > { %2188 = vsyncadd (%p2794_p8), %s479_s23, 4294967168  ;;  %s487_s21 = sand.u32 1, %s2329_s17   ;;  %s491_s29 = scalar_lea.vmem [#allocation5], %s2511_s10 }
  0x97   : > { %s488_s12 = scalar_lea.sflag [#allocation6], %s487_s21 }
  0x98   : > { %2190 = dma.done.wait (%p2794_p8), %s488_s12, 128  }
  0x99   : > { %2192 = vsyncadd (%p2794_p8), %s488_s12, 4294967168  ;;  %p2795_p11 = scmp.eq.s32.totalorder %s2329_s17, 0 }
  0x9b   : > { %2194 = dma.done.wait (%p2795_p11), [#allocation6], 512   ;;  %p2796_p0 = pmov %p2795_p11 }
  0x9d   : > { %2196 = vsyncadd (%p2796_p0), [#allocation6], 4294966784  ;;  %p2797_p9 = pmov %p2796_p0 }
  0x9e   : > { %p2798_p12 = pmov %p2796_p0 }
  0x9f   : > { %2198 = dma.done.wait (%p2797_p9), [#allocation9], 512  }
  0xa0   : > { %2200 = vsyncadd (%p2798_p12), [#allocation9], 4294966784  ;;  %vm551_vm0 = vcmask 261120   ;;  %v2533_v0 = vld [vmem:[%s482_s24] sm:$0xff]  ;;  %v577_v9 = vld [vmem:[%s2749_s2 + $0x10] sm:$0xff]  ;;  %v2227_v10 = vmov 0.0|0.0  }
  0xa1   : > { %v552_v1 = vsel %vm551_vm0, %v2533_v0, 0.0  ;;  %v575_v7 = vld [vmem:[%s2749_s2] sm:$0xff]  ;;  %v576_v8 = vld [vmem:[%s2749_s2 + $0x8] sm:$0xff]  ;;  %1868 = vmatprep.subr.bf16.mxu1 %v2227_v10  ;;  %v578_v12 = vld [vmem:[%s2749_s2 + $0x18] sm:$0xff]  ;;  %vm2228_vm1 = vmmov 0   ;;  %v2229_v13 = vmov 0.0   ;;  %1874 = vmatprep.subr.bf16.mxu0 %v2227_v10 }
  0xa2   : > { %553 = vadd.xlane.f32.xlu0 %v552_v1  ;;  %v1869_v11 = vpack.c.bf16 %v576_v8, %v575_v7  ;;  %1771 = vmatprep.mubr.msk.f32.mxu1 %vm2228_vm1, %v2229_v13  ;;  %v1872_v14 = vpack.c.bf16 %v578_v12, %v577_v9  ;;  %v1693_v26 = vld [vmem:[%s2750_s3] ss:$0 sm:$0xff]  ;;  %s2230_s11 = smov 96   ;;  %vm741_vm4 = vcmask 64512   ;;  %s2231_s23 = smov 64   ;;  %v660_v40 = vld [vmem:[%s2751_s4 + $0x8] sm:$0xff] }
  0xa3   : > { %1792 = vmatprep.mubr.msk.f32.mxu0 %vm2228_vm1, %v2229_v13  ;;  %v659_v39 = vld [vmem:[%s2751_s4] sm:$0xff]  ;;  %v661_v41 = vld [vmem:[%s2751_s4 + $0x10] sm:$0xff]  ;;  %v662_v43 = vld [vmem:[%s2751_s4 + $0x18] sm:$0xff]  ;;  %s2799_s14 = sld [smem:[#allocation24_spill]]  ;;  %s2800_s8 = sld [smem:[#allocation23_spill]]  ;;  %vm1468_vm9 = vcmask 523264  }
  0xa4   : > { %1870 = vmatpush3.bf16.msra.mxu1 %v1869_v11  ;;  %v1875_v42 = vpack.c.bf16 %v660_v40, %v659_v39  ;;  %v1878_v44 = vpack.c.bf16 %v662_v43, %v661_v41  ;;  %v1698_v51 = vld [vmem:[%s2752_s5] ss:$0 sm:$0xff]  ;;  %v931_v58 = vld [vmem:[%s2753_s6 + $0x8] sm:$0xff]  ;;  %v932_v61 = vld [vmem:[%s2753_s6 + $0x10] sm:$0xff]  ;;  %s1713_s24 = sshll.u32 %s2329_s17, 7  ;;  %s548_s21 = scalar_lea.vmem [#allocation10], %s2511_s10 }
  0xa5   : > { %1871 = vmatprep.subr.bf16.mxu1 %v2227_v10  ;;  %v930_v57 = vld [vmem:[%s2753_s6] sm:$0xff]  ;;  %v933_v62 = vld [vmem:[%s2753_s6 + $0x18] sm:$0xff]  ;;  %s1566_s12 = sshll.u32 %s548_s21, 4  ;;  %s2802_s20 = sld [smem:[#allocation26_spill]]  ;;  %s2704_s12 = int_to_ptr.vmem [resolvable:$true] %s1566_s12 }
  0xa6   : > { %1876 = vmatpush3.bf16.msra.mxu0 %v1875_v42  ;;  %v1995_v59 = vpack.i.bf16 %v931_v58, %v930_v57  ;;  %v1881_v60 = vpack.c.bf16 %v931_v58, %v930_v57  ;;  %v2000_v63 = vpack.i.bf16 %v933_v62, %v932_v61  ;;  %v1706_v57 = vld [vmem:[%s2756_s9] ss:$0 sm:$0xff]  ;;  %s2141_s17 = scalar_lea.vmem %s2704_s12, 128  ;;  %p2803_p13 = scmp.ne.s32.totalorder %s2790_s27, 0 }
  0xa7   : > { %1877 = vmatprep.subr.bf16.mxu0 %v2227_v10  ;;  %p2142_p2 = scmp.ne.s32.totalorder %s2704_s12, %s2141_s17  ;;  %s2232_s10 = smov [#allocation10]  }
  0xa8   : > { %1873 = vmatpush3.bf16.msra.mxu1 %v1872_v14  ;;  %s2145_s18 = sshll.u32 %s2232_s10, 4  ;;  %s2146_s18 = int_to_ptr.vmem [resolvable:$false] %s2145_s18 }
  0xa9   : > { %1774 = vmatprep.subr.mxu1 %v2229_v13  ;;  %p2143_p6 = pnand %p2142_p2, %p2803_p13  ;;  %s2147_s28 = scalar_lea.vmem %s2146_s18, 256 }
  0xaa   : > { %1879 = vmatpush3.bf16.msra.mxu0 %v1878_v44  ;;  %p2148_p4 = scmp.lt.s32.totalorder %s2704_s12, %s2146_s18  ;;  %p2149_p5 = scmp.lt.s32.totalorder %s2147_s28, %s2141_s17 }
  0xab   : > { %1886 = vmatprep.subr.bf16.mxu0 %v2227_v10  ;;  %p2144_p10 = pneg %p2143_p6 }
  0xac   : > { %p2150_p3 = por %p2149_p5, %p2148_p4 }
  0xae   : > { %p2151_p7 = pnand %p2150_p3, %p2144_p10 }
 0x12f   : > { %v554_v2 = vpop.xlane.xlu0 %553 }
 0x130   : > { %v556_v3 = vmul.f32 0.03125, %v554_v2 }
 0x132   : > { %v557_v4 = vsub.f32 %v2533_v0, %v556_v3 }
 0x134   : > { %v558_v5 = vmul.f32 %v557_v4, %v557_v4 }
 0x136   : > { %v559_v6 = vsel %vm551_vm0, %v558_v5, 0.0 }
 0x137   : > { %560 = vadd.xlane.f32.xlu0 %v559_v6  ;;  %v1700_v6 = vld [vmem:[%s2754_s7] ss:$0 sm:$0xff] }
 0x1c4   : > { %v561_v15 = vpop.xlane.xlu0 %560 }
 0x1c5   : > { %v563_v16 = vmul.f32 0.032258064, %v561_v15 }
 0x1c7   : > { %2005 = vrsqrt.f32 %v563_v16  ;;  %vm566_vm2 = vcmp.eq.f32.partialorder %v563_v16, inf  ;;  %v569_v19 = vand.u32 2147483648, %v563_v16  ;;  %vm568_vm3 = vcmp.eq.f32.partialorder %v563_v16, 0.0 }
 0x1d1   : > { %v2006_v17 = vpop.eup %2005 }
 0x1d2   : > { %v565_v18 = vmul.f32 %v2006_v17, %v563_v16 }
 0x1d4   : > { %v567_v20 = vsel %vm566_vm2, %v563_v16, %v565_v18 }
 0x1d5   : > { %v570_v21 = vsel %vm568_vm3, %v569_v19, %v567_v20  ;;  %v550_v20 = vld [vmem:[%s491_s29] sm:$0xff]  ;;  %s2702_s29 = scalar_lea.hbm %s2802_s20, %s1713_s24 }
 0x1d6   : > { %v571_v22 = vadd.f32 1e-06, %v570_v21 }
 0x1d8   : > { %2007 = vrcp.f32 %v571_v22 }
 0x1e2   : > { %v2008_v23 = vpop.eup %2007 }
 0x1e3   : > { %v573_v24 = vmul.f32 %v2008_v23, %v557_v4 }
 0x1e5   : > { %v574_v25 = vadd.f32 1.0, %v573_v24 }
 0x1e7   : > { %1772 = vmatmul.mubr.msk.f32.vlgmr.msra.gmra.mrb[0].mxu1 %vm551_vm0, %v574_v25 }
 0x1e8   : > { %1776 = vmatprep.mubr.msk.f32.mxu1 %vm2228_vm1, %v2229_v13 }
 0x2ba   : > { %v655_v27 = vpop.f32.mrb[0].mxu1 }
 0x2bb   : > { %v656_v28 = vadd.f32 %v1693_v26, %v655_v27  ;;  %v1773_v29 = vpop.f32.mrb[1].mxu1 }
 0x2bd   : > { %665 = vrot.lane.b32.xlu1 %v656_v28, %s2230_s11 }
 0x32f   : > { %v666_v30 = vpop.permute.xlu1 %665 }
 0x330   : > { %1775 = vmatpush3.xpose.msk.msra.mxu1 %vm551_vm0, %v666_v30 }
 0x331   : > { %1779 = vmatprep.subr.mxu1 %v2229_v13 }
 0x333   : > { %1777 = vmatmul.mubr.msk.f32.vlgmr.msra.gmra.mrb[2].mxu1 %vm551_vm0, %v656_v28 }
 0x334   : > { %1781 = vmatprep.mubr.msk.f32.mxu1 %vm2228_vm1, %v2229_v13 }
 0x406   : > { %v737_v31 = vpop.f32.mrb[2].mxu1 }
 0x407   : > { %v1778_v32 = vpop.f32.mrb[3].mxu1  ;;  %v742_v33 = vsel %vm741_vm4, %v737_v31, -inf }
 0x408   : > { %743 = vmax.xlane.f32.xlu1 %v742_v33 }
 0x495   : > { %v744_v34 = vpop.xlane.xlu1 %743 }
 0x496   : > { %v745_v35 = vsub.f32 %v737_v31, %v744_v34 }
 0x498   : > { %v746_v36 = vmul.f32 1.442695, %v745_v35 }
 0x49a   : > { %2009 = vpow2.f32 %v746_v36 }
 0x4a4   : > { %v2010_v37 = vpop.eup %2009 }
 0x4a5   : > { %v748_v38 = vsel %vm741_vm4, %v2010_v37, 0.0 }
 0x4a6   : > { %749 = vadd.xlane.f32.xlu0 %v748_v38 }
 0x4bc   : > { %753 = vrot.lane.b32.xlu0 %v656_v28, %s2231_s23  ;;  %s2801_s23 = sld [smem:[#allocation25_spill]] }
 0x533   : > { %v750_v45 = vpop.xlane.xlu0 %749 }
 0x534   : > { %2011 = vrcp.f32 %v750_v45  ;;  %v1106_v45 = vld [vmem:[#allocation7] sm:$0xff] }
 0x537   : > { %v754_v46 = vpop.permute.xlu0 %753 }
 0x538   : > { %1780 = vmatpush3.msra.mxu1 %v754_v46  ;;  %v1107_v46 = vld [vmem:[#allocation7 + $0x8] sm:$0xff] }
 0x539   : > { %1880 = vmatprep.subr.bf16.mxu1 %v2227_v10 }
 0x53e   : > { %v2012_v47 = vpop.eup %2011 }
 0x53f   : > { %v752_v48 = vmul.f32 %v2012_v47, %v2010_v37  ;;  %v1108_v47 = vld [vmem:[#allocation7 + $0x10] sm:$0xff] }
 0x541   : > { %1782 = vmatmul.mubr.msk.f32.vlgmr.msra.gmra.mrb[4].mxu1 %vm741_vm4, %v752_v48  ;;  %v1893_v48 = vpack.c.bf16 %v1107_v46, %v1106_v45 }
 0x542   : > { %1803 = vmatprep.mubr.msk.f32.mxu1 %vm2228_vm1, %v2229_v13  ;;  %1882 = vmatpush3.bf16.msra.mxu1 %v1881_v60 }
 0x543   : > { %1883 = vmatprep.subr.bf16.mxu1 %v2227_v10 }
 0x614   : > { %v825_v49 = vpop.f32.mrb[4].mxu1 }
 0x615   : > { %v1783_v50 = vpop.f32.mrb[5].mxu1  ;;  %1793 = vmatmul.mubr.msk.f32.vlgmr.msra.gmra.mrb[0].mxu0 %vm551_vm0, %v825_v49  ;;  %v1109_v49 = vld [vmem:[#allocation7 + $0x18] sm:$0xff] }
 0x616   : > { %1814 = vmatprep.mubr.msk.f32.mxu0 %vm2228_vm1, %v2229_v13  ;;  %v1896_v50 = vpack.c.bf16 %v1109_v49, %v1108_v47 }
 0x6e8   : > { %v904_v52 = vpop.f32.mrb[0].mxu0 }
 0x6e9   : > { %v905_v53 = vadd.f32 %v1698_v51, %v904_v52  ;;  %v1794_v54 = vpop.f32.mrb[1].mxu0 }
 0x6eb   : > { %v2598_v55 = vadd.f32 %v905_v53, %v2533_v0  ;;  %v1884_v0 = vpack.c.bf16 %v933_v62, %v932_v61 }
 0x6ed   : > { %v909_v56 = vsel %vm551_vm0, %v2598_v55, 0.0  ;;  %1885 = vmatpush3.bf16.msra.mxu1 %v1884_v0 }
 0x6ee   : > { %910 = vadd.xlane.f32.xlu0 %v909_v56  ;;  %1817 = vmatprep.subr.mxu1 %v2229_v13 }
 0x704   : > { %1030 = vrot.lane.b32.xlu0 %v1700_v6, %s2230_s11 }
 0x77b   : > { %v911_v1 = vpop.xlane.xlu0 %910 }
 0x77c   : > { %v912_v2 = vmul.f32 0.03125, %v911_v1 }
 0x77e   : > { %v913_v3 = vsub.f32 %v2598_v55, %v912_v2 }
 0x77f   : > { %v1031_v29 = vpop.permute.xlu0 %1030 }
 0x780   : > { %v914_v4 = vmul.f32 %v913_v3, %v913_v3 }
 0x782   : > { %v915_v5 = vsel %vm551_vm0, %v914_v4, 0.0  ;;  %v1376_v4 = vld [vmem:[#allocation8 + $0x8] sm:$0xff] }
 0x783   : > { %916 = vadd.xlane.f32.xlu1 %v915_v5  ;;  %v1377_v5 = vld [vmem:[#allocation8 + $0x10] sm:$0xff] }
 0x794   : > { %1996 = vrot.lane.b32.xlu1 %v1995_v59, %s2230_s11 }
 0x798   : > { %2001 = vrot.lane.b32.xlu1 %v2000_v63, %s2230_s11 }
 0x810   : > { %v917_v7 = vpop.xlane.xlu1 %916 }
 0x811   : > { %v918_v8 = vmul.f32 0.032258064, %v917_v7  ;;  %v1378_v7 = vld [vmem:[#allocation8 + $0x18] sm:$0xff] }
 0x813   : > { %2013 = vrsqrt.f32 %v918_v8  ;;  %vm921_vm5 = vcmp.eq.f32.partialorder %v918_v8, inf  ;;  %v924_v22 = vand.u32 2147483648, %v918_v8  ;;  %vm923_vm6 = vcmp.eq.f32.partialorder %v918_v8, 0.0 }
 0x814   : > { %v1997_v9 = vpop.permute.xlu1 %1996 }
 0x815   : > { %v1999_v11 = vunpack.i.h.bf16 %v1997_v9  ;;  %v1998_v12 = vunpack.i.l.bf16 %v1997_v9  ;;  %v1461_v9 = vld [vmem:[%s2799_s14 + $0x8] sm:$0xff] }
 0x817   : > { %v1887_v14 = vpack.c.bf16 %v1999_v11, %v1998_v12  ;;  %v1462_v11 = vld [vmem:[%s2799_s14 + $0x10] sm:$0xff] }
 0x818   : > { %v2002_v15 = vpop.permute.xlu1 %2001 }
 0x819   : > { %v2004_v16 = vunpack.i.h.bf16 %v2002_v15  ;;  %v2003_v17 = vunpack.i.l.bf16 %v2002_v15  ;;  %1888 = vmatpush3.bf16.msra.mxu0 %v1887_v14  ;;  %v1463_v14 = vld [vmem:[%s2799_s14 + $0x18] sm:$0xff] }
 0x81a   : > { %1889 = vmatprep.subr.bf16.mxu0 %v2227_v10  ;;  %v1908_v15 = vpack.c.bf16 %v1463_v14, %v1462_v11 }
 0x81b   : > { %v1890_v18 = vpack.c.bf16 %v2004_v16, %v2003_v17  ;;  %v1464_v16 = vld [vmem:[%s2799_s14 + $0x20] sm:$0xff]  ;;  %v1465_v17 = vld [vmem:[%s2799_s14 + $0x28] sm:$0xff] }
 0x81d   : > { %v2014_v19 = vpop.eup %2013  ;;  %1891 = vmatpush3.bf16.msra.mxu0 %v1890_v18  ;;  %v1911_v18 = vpack.c.bf16 %v1465_v17, %v1464_v16 }
 0x81e   : > { %v920_v21 = vmul.f32 %v2014_v19, %v918_v8  ;;  %1892 = vmatprep.subr.bf16.mxu0 %v2227_v10 }
 0x820   : > { %v922_v23 = vsel %vm921_vm5, %v918_v8, %v920_v21  ;;  %1815 = vmatmul.mubr.msk.f32.vlgmr.msra.gmra.mrb[2].mxu0 %vm551_vm0, %v550_v20  ;;  %v1460_v8 = vld [vmem:[%s2799_s14] sm:$0xff] }
 0x821   : > { %v925_v24 = vsel %vm923_vm6, %v924_v22, %v922_v23  ;;  %1835 = vmatprep.mubr.msk.f32.mxu0 %vm2228_vm1, %v2229_v13  ;;  %1894 = vmatpush3.bf16.msra.mxu0 %v1893_v48  ;;  %v1905_v12 = vpack.c.bf16 %v1461_v9, %v1460_v8 }
 0x822   : > { %v926_v25 = vadd.f32 1e-06, %v925_v24  ;;  %1895 = vmatprep.subr.bf16.mxu0 %v2227_v10 }
 0x824   : > { %2015 = vrcp.f32 %v926_v25 }
 0x825   : > { %1897 = vmatpush3.bf16.msra.mxu0 %v1896_v50 }
 0x826   : > { %1904 = vmatprep.subr.bf16.mxu0 %v2227_v10 }
 0x82e   : > { %v2016_v26 = vpop.eup %2015 }
 0x82f   : > { %v928_v27 = vmul.f32 %v2016_v26, %v913_v3  ;;  %v1375_v3 = vld [vmem:[#allocation8] sm:$0xff] }
 0x831   : > { %v929_v28 = vadd.f32 1.0, %v928_v27 }
 0x833   : > { %1804 = vmatmul.mubr.msk.f32.vlgmr.msra.gmra.mrb[6].mxu1 %vm551_vm0, %v929_v28 }
 0x834   : > { %1819 = vmatprep.mubr.msk.f32.mxu1 %vm2228_vm1, %v2229_v13 }
 0x8f3   : > { %v1102_v30 = vpop.f32.mrb[2].mxu0 }
 0x8f4   : > { %v1103_v31 = vadd.f32 %v1102_v30, %v1031_v29  ;;  %v1816_v32 = vpop.f32.mrb[3].mxu0  ;;  %v1467_v30 = vld [vmem:[%s2799_s14 + $0x38] sm:$0xff] }
 0x8f5   : > { %v1708_v32 = vld [vmem:[%s2800_s8] ss:$0 sm:$0xff] }
 0x8f6   : > { %1818 = vmatpush3.xpose.msk.msra.mxu1 %vm551_vm0, %v1103_v31 }
 0x8f7   : > { %1822 = vmatprep.subr.mxu1 %v2229_v13 }
 0x906   : > { %v1010_v33 = vpop.f32.mrb[6].mxu1 }
 0x907   : > { %v1011_v34 = vadd.f32 %v1700_v6, %v1010_v33  ;;  %v1805_v35 = vpop.f32.mrb[7].mxu1  ;;  %v1899_v6 = vpack.c.bf16 %v1376_v4, %v1375_v3 }
 0x909   : > { %1820 = vmatmul.mubr.msk.f32.vlgmr.msra.gmra.mrb[8].mxu1 %vm551_vm0, %v1011_v34 }
 0x90a   : > { %1824 = vmatprep.mubr.msk.f32.mxu1 %vm2228_vm1, %v2229_v13 }
 0x9dc   : > { %v1183_v36 = vpop.f32.mrb[8].mxu1 }
 0x9dd   : > { %v1821_v37 = vpop.f32.mrb[9].mxu1  ;;  %v1187_v38 = vsel %vm741_vm4, %v1183_v36, -inf }
 0x9de   : > { %1188 = vmax.xlane.f32.xlu1 %v1187_v38  ;;  %v1711_v38 = vld [vmem:[%s2801_s23] ss:$0 sm:$0xff] }
 0x9ef   : > { %1198 = vrot.lane.b32.xlu1 %v1103_v31, %s2230_s11  ;;  %s1553_s11 = scalar_lea.sflag [#allocation4], %s2508_s22 }
 0xa6b   : > { %v1189_v39 = vpop.xlane.xlu1 %1188 }
 0xa6c   : > { %v1190_v40 = vsub.f32 %v1183_v36, %v1189_v39 }
 0xa6e   : > { %v1191_v41 = vmul.f32 1.442695, %v1190_v40 }
 0xa6f   : > { %v1199_v42 = vpop.permute.xlu1 %1198 }
 0xa70   : > { %2017 = vpow2.f32 %v1191_v41  ;;  %1823 = vmatpush3.msra.mxu1 %v1199_v42 }
 0xa71   : > { %1898 = vmatprep.subr.bf16.mxu1 %v2227_v10 }
 0xa7a   : > { %v2018_v43 = vpop.eup %2017 }
 0xa7b   : > { %v1193_v44 = vsel %vm741_vm4, %v2018_v43, 0.0 }
 0xa7c   : > { %1194 = vadd.xlane.f32.xlu0 %v1193_v44 }
 0xb09   : > { %v1195_v51 = vpop.xlane.xlu0 %1194 }
 0xb0a   : > { %2019 = vrcp.f32 %v1195_v51 }
 0xb14   : > { %v2020_v52 = vpop.eup %2019 }
 0xb15   : > { %v1197_v53 = vmul.f32 %v2020_v52, %v2018_v43 }
 0xb17   : > { %1825 = vmatmul.mubr.msk.f32.vlgmr.msra.gmra.mrb[10].mxu1 %vm741_vm4, %v1197_v53 }
 0xb18   : > { %1846 = vmatprep.mubr.msk.f32.mxu1 %vm2228_vm1, %v2229_v13  ;;  %1900 = vmatpush3.bf16.msra.mxu1 %v1899_v6 }
 0xb19   : > { %1901 = vmatprep.subr.bf16.mxu1 %v2227_v10 }
 0xbea   : > { %v1270_v54 = vpop.f32.mrb[10].mxu1 }
 0xbeb   : > { %v1826_v56 = vpop.f32.mrb[11].mxu1  ;;  %1836 = vmatmul.mubr.msk.f32.vlgmr.msra.gmra.mrb[4].mxu0 %vm551_vm0, %v1270_v54 }
 0xbec   : > { %1865 = vmatprep.mubr.msk.f32.mxu0 %vm2228_vm1, %v2229_v13  ;;  %1906 = vmatpush3.bf16.msra.mxu0 %v1905_v12 }
 0xbed   : > { %1907 = vmatprep.subr.bf16.mxu0 %v2227_v10 }
 0xbf0   : > { %1909 = vmatpush3.bf16.msra.mxu0 %v1908_v15 }
 0xbf1   : > { %1910 = vmatprep.subr.bf16.mxu0 %v2227_v10 }
 0xbf4   : > { %1912 = vmatpush3.bf16.msra.mxu0 %v1911_v18 }
 0xbf5   : > { %1913 = vmatprep.subr.bf16.mxu0 %v2227_v10  ;;  %v1466_v10 = vld [vmem:[%s2799_s14 + $0x30] sm:$0xff] }
 0xbf6   : > { %v1914_v31 = vpack.c.bf16 %v1467_v30, %v1466_v10 }
 0xbf8   : > { %1915 = vmatpush3.bf16.msra.mxu0 %v1914_v31 }
 0xcbe   : > { %v1349_v58 = vpop.f32.mrb[4].mxu0 }
 0xcbf   : > { %v1350_v59 = vadd.f32 %v1706_v57, %v1349_v58  ;;  %v1837_v60 = vpop.f32.mrb[5].mxu0 }
 0xcc1   : > { %v2655_v61 = vadd.f32 %v1350_v59, %v2598_v55  ;;  %v1902_v55 = vpack.c.bf16 %v1378_v7, %v1377_v5 }
 0xcc3   : > { %v1354_v62 = vsel %vm551_vm0, %v2655_v61, 0.0  ;;  %1903 = vmatpush3.bf16.msra.mxu1 %v1902_v55 }
 0xcc4   : > { %1355 = vadd.xlane.f32.xlu0 %v1354_v62 }
 0xd51   : > { %v1356_v63 = vpop.xlane.xlu0 %1355 }
 0xd52   : > { %v1357_v0 = vmul.f32 0.03125, %v1356_v63 }
 0xd54   : > { %v1358_v1 = vsub.f32 %v2655_v61, %v1357_v0 }
 0xd56   : > { %v1359_v2 = vmul.f32 %v1358_v1, %v1358_v1 }
 0xd58   : > { %v1360_v13 = vsel %vm551_vm0, %v1359_v2, 0.0 }
 0xd59   : > { %1361 = vadd.xlane.f32.xlu1 %v1360_v13 }
 0xde6   : > { %v1362_v19 = vpop.xlane.xlu1 %1361 }
 0xde7   : > { %v1363_v20 = vmul.f32 0.032258064, %v1362_v19 }
 0xde9   : > { %2021 = vrsqrt.f32 %v1363_v20  ;;  %vm1366_vm7 = vcmp.eq.f32.partialorder %v1363_v20, inf  ;;  %v1369_v23 = vand.u32 2147483648, %v1363_v20  ;;  %vm1368_vm8 = vcmp.eq.f32.partialorder %v1363_v20, 0.0 }
 0xdf3   : > { %v2022_v21 = vpop.eup %2021 }
 0xdf4   : > { %v1365_v22 = vmul.f32 %v2022_v21, %v1363_v20 }
 0xdf6   : > { %v1367_v24 = vsel %vm1366_vm7, %v1363_v20, %v1365_v22 }
 0xdf7   : > { %v1370_v25 = vsel %vm1368_vm8, %v1369_v23, %v1367_v24 }
 0xdf8   : > { %v1371_v26 = vadd.f32 1e-06, %v1370_v25 }
 0xdfa   : > { %2023 = vrcp.f32 %v1371_v26 }
 0xe04   : > { %v2024_v27 = vpop.eup %2023 }
 0xe05   : > { %v1373_v28 = vmul.f32 %v2024_v27, %v1358_v1 }
 0xe07   : > { %v1374_v29 = vadd.f32 1.0, %v1373_v28 }
 0xe09   : > { %1847 = vmatmul.mubr.msk.f32.vlgmr.msra.gmra.mrb[12].mxu1 %vm551_vm0, %v1374_v29 }
 0xedc   : > { %v1455_v33 = vpop.f32.mrb[12].mxu1 }
 0xedd   : > { %v1456_v34 = vadd.f32 %v1708_v32, %v1455_v33  ;;  %v1848_v35 = vpop.f32.mrb[13].mxu1 }
 0xedf   : > { %v1459_v36 = vmax.f32 %v1456_v34, 0.0 }
 0xee1   : > { %1866 = vmatmul.mubr.msk.f32.vlgmr.msra.gmra.mrb[6].mxu0 %vm1468_vm9, %v1459_v36 }
 0xfb4   : > { %v1538_v37 = vpop.f32.mrb[6].mxu0 }
 0xfb5   : > { %v1542_v39 = vadd.f32 %v1538_v37, %v2655_v61  ;;  %v1867_v40 = vpop.f32.mrb[7].mxu0 }
 0xfb7   : > { %v1550_v41 = vadd.f32 %v1711_v38, %v1542_v39 }
 0xfb9   : > { %1551 = vst.msk [vmem:[%s548_s21] sm:$0xff] %vm551_vm0, %v1550_v41 }
 0xfba   : > { %2154 = shalt.err (!%p2151_p7)
}
 0xfbb   : > { %s2155_s22 = scalar_lea.hbm %s2702_s29, 128  ;;  %s2159_s26 = scalar_lea.hbm %s2802_s20, 256 }
 0xfbc   : > { %p2156_p1 = scmp.ne.s32.totalorder %s2702_s29, %s2155_s22  ;;  %p2160_p0 = scmp.lt.u32.totalorder %s2702_s29, %s2802_s20 }
 0xfbd   : > { %p2161_p9 = scmp.lt.u32.totalorder %s2159_s26, %s2155_s22  ;;  %p2163_p2 = scmp.lt.u32.totalorder %s2155_s22, %s2702_s29 }
 0xfbe   : > { %p2157_p8 = pnand %p2156_p1, %p2803_p13 }
 0xfbf   : > { %p2162_p12 = por %p2161_p9, %p2160_p0 }
 0xfc0   : > { %p2158_p11 = pneg %p2157_p8 }
 0xfc1   : > { %p2164_p6 = por %p2163_p2, %p2162_p12 }
 0xfc3   : > { %p2165_p10 = pnand %p2164_p6, %p2158_p11 }
 0xfc5   : > { %2168 = shalt.err (!%p2165_p10)
}
 0xfc6   : > { %1928 = dma.vmem_to_hbm [thread:$0]  (%p2803_p13), %s2704_s12, 128, %s2702_s29, %s1553_s11  }
 0xfc7 PF: > { %s2804_s24 = sld [smem:[#allocation16_spill]]  ;;  %s2805_s21 = sld [smem:[#allocation18_spill]] }
 0xfc8   : > { %p2807_p5 = scmp.ge.s32.totalorder %s2219_s16, 2 }
 0xfcd   : > { %s1578_s19 = sand.u32 1, %s2804_s24   ;;  %p2806_p4 = scmp.ne.s32.totalorder %s2805_s21, 0 }
 0xfce   : > { %s1579_s15 = scalar_lea.sflag [#allocation4], %s1578_s19 }
 0xfcf   : > { %p1945_p3 = pnand %p2807_p5, %p2806_p4 }
 0xfd1   : > { %2202 = dma.done.wait (!%p1945_p3), %s1579_s15, 128  }
 0xfd2   : > { %2204 = vsyncadd (!%p1945_p3), %s1579_s15, 4294967168  ;;  %s2808_s16 = sld [smem:[#allocation19_spill]]  ;;  %s2809_s17 = sld [smem:[#allocation17_spill]] }
 0xfd3   : > { %s2810_s15 = sld [smem:[#allocation20_spill]]  ;;  %s2811_s29 = smov %s2211_s30 }
 0xfd8   : > { %p31_p7 = scmp.ge.s32.totalorder %s2808_s16, 4   ;;  %s2812_s30 = smov %s2809_s17 }
 0xfda   :  { %33 = sbr.rel (!%p31_p7) target bundleno = 15 (0xf), region = 142 }
 0xfe1   :  { %1584 = vsyncpa [#allocation3], 1 }
 0xfe2   :  { %1586 = vsyncpa [#allocation3 + $0x1], 1 }
 0xfe3   :  { %1587 = vsyncpa [#allocation6], 1 }
 0xfe4   :  { %1589 = vsyncpa [#allocation6 + $0x1], 1 }
 0xfe5   :  { %1590 = vsyncpa [#allocation9], 1 }
 0xfe6   :  { %1591 = vsyncpa [#allocation4], 1 }
 0xfe7   :  { %1593 = vsyncpa [#allocation4 + $0x1], 1 }

</bundles_post_ra>
